<compile_context>
chip_gen: v6e
topology: v6e:2x2x1
jax: 0.10.0
libtpu: 0.0.40
codegen_flags: <defaults>
</compile_context>

<pallas_src>
import functools

import jax
import jax.numpy as jnp
from jax import lax
from jax.experimental import pallas as pl
from jax.experimental.pallas import tpu as pltpu


def _round_up(x, m):
    return ((x + m - 1) // m) * m


def _matmul_kernel(a_ref, b_ref, o_ref, acc_ref):
    """Tiled matmul; f32 VMEM accumulator over the contraction grid axis."""
    @pl.when(pl.program_id(2) == 0)
    def _():
        acc_ref[...] = jnp.zeros_like(acc_ref)

    acc_ref[...] += jnp.dot(a_ref[...], b_ref[...],
                            preferred_element_type=jnp.float32)

    @pl.when(pl.program_id(2) == pl.num_programs(2) - 1)
    def _():
        o_ref[...] = acc_ref[...].astype(o_ref.dtype)


def _tiled_matmul(a, b, out_dtype, tm, tn, tk):
    """a: (M, K), b: (K, N), all dims already padded to tile multiples."""
    M, K = a.shape
    _, N = b.shape
    grid = (M // tm, N // tn, K // tk)
    return pl.pallas_call(
        _matmul_kernel,
        out_shape=jax.ShapeDtypeStruct((M, N), out_dtype),
        grid_spec=pltpu.PrefetchScalarGridSpec(
            num_scalar_prefetch=0,
            grid=grid,
            in_specs=[
                pl.BlockSpec((tm, tk), lambda i, j, k: (i, k)),
                pl.BlockSpec((tk, tn), lambda i, j, k: (k, j)),
            ],
            out_specs=pl.BlockSpec((tm, tn), lambda i, j, k: (i, j)),
            scratch_shapes=[pltpu.VMEM((tm, tn), jnp.float32)],
        ),
        compiler_params=pltpu.CompilerParams(
            dimension_semantics=("parallel", "parallel", "arbitrary")),
    )(a, b)


def fsconv2d_pallas(x_nchw, w_oihw):
    """F.conv2d(x, w) with stride=1, padding=0, no bias (PyTorch defaults)."""
    N, C, H, W = x_nchw.shape
    OC, _, K, _ = w_oihw.shape
    Ho, Wo = H - K + 1, W - K + 1
    M = N * Ho * Wo
    KD = K * K * C

    # ---- wrapper-side im2col (XLA): one clean (M, K*K*Cin) matmul operand ----
    # TODO(synk): for very large activations the K*K memory blowup of im2col
    # could instead be avoided with halo BlockSpecs + in-kernel rolls.
    x_nhwc = jnp.transpose(x_nchw, (0, 2, 3, 1))                 # NCHW -> NHWC
    cols = []
    for kh in range(K):
        for kw in range(K):
            cols.append(x_nhwc[:, kh:kh + Ho, kw:kw + Wo, :])    # (N,Ho,Wo,C)
    patches = jnp.concatenate(cols, axis=-1).reshape(M, KD)      # (M, K*K*C)

    # Weight: OIHW -> (K, K, Cin, OC) -> (K*K*Cin, OC); matches patch ordering.
    w2d = jnp.transpose(w_oihw, (2, 3, 1, 0)).reshape(KD, OC)

    # ---- pad to MXU/lane-friendly tiles (lane-dense output: OC -> mult 128) --
    tm = 256 if M >= 256 else _round_up(M, 8)
    tk = 512 if KD >= 512 else _round_up(KD, 128)
    oc_pad = _round_up(OC, 128)
    tn = 256 if oc_pad >= 256 else oc_pad

    m_pad = _round_up(M, tm)
    kd_pad = _round_up(KD, tk)
    n_pad = _round_up(oc_pad, tn)

    a = jnp.zeros((m_pad, kd_pad), patches.dtype).at[:M, :KD].set(patches)
    b = jnp.zeros((kd_pad, n_pad), w2d.dtype).at[:KD, :OC].set(w2d)

    out2d = _tiled_matmul(a, b, x_nchw.dtype, tm, tn, tk)        # (m_pad,n_pad)

    out = out2d[:M, :OC].reshape(N, Ho, Wo, OC)
    return jnp.transpose(out, (0, 3, 1, 2))                      # NHWC -> NCHW


def build_fs_weights(FS, in_channels, out_channels, kernel_size):
    """Plain-JAX glue mirroring FSConv2d._build_kernel (parameter setup)."""
    k = in_channels * kernel_size * kernel_size
    L = FS.shape[0]
    s = L // out_channels
    pad = jnp.zeros((k // 2,), FS.dtype)
    padded = jnp.concatenate([pad, FS, pad])
    patches = [lax.dynamic_slice(padded, (i * s,), (k,))
               for i in range(out_channels)]
    weights = jnp.concatenate(patches, 0)
    return weights.reshape(out_channels, in_channels, kernel_size, kernel_size)


if __name__ == "__main__":
    # Module config (small, consistent with the forward): comp_ratio=2,
    # in_channels=4, out_channels=8, kernel_size=3; input x: (2, 4, 16, 16).
    comp_ratio, Cin, Cout, Ks = 2, 4, 8, 3
    N, H, W = 2, 16, 16
    L = Cin * Cout * Ks * Ks // comp_ratio        # = 144
    assert L % Cout == 0

    key = jax.random.PRNGKey(0)
    k_fs, k_x = jax.random.split(key)
    FS = jax.random.normal(k_fs, (L,), dtype=jnp.float32)   # nn.init.normal_(FS)
    x = jax.random.normal(k_x, (N, Cin, H, W), dtype=jnp.float32)
    # TODO(synk): bias path of the PyTorch module is not exercised (its
    # `if self.bias:` guard cannot evaluate a multi-element Parameter).

    weights = build_fs_weights(FS, Cin, Cout, Ks)            # (Cout, Cin, K, K)
    out = fsconv2d_pallas(x, weights)                        # (N, Cout, 14, 14)
    out = jax.block_until_ready(out)

    # Cross-check against XLA's conv for correctness.
    ref = lax.conv_general_dilated(
        x, weights, window_strides=(1, 1), padding="VALID",
        dimension_numbers=("NCHW", "OIHW", "NCHW"))
    assert out.shape == (N, Cout, H - Ks + 1, W - Ks + 1)
    assert jnp.allclose(out, ref, atol=1e-4, rtol=1e-4)

    print("KERNEL_OK")
</pallas_src>

<mosaic_0001>
module attributes {stable_mosaic.version = 11 : i64} {
  func.func @_matmul_kernel(%arg0: i32, %arg1: i32, %arg2: i32, %arg3: memref<256x128xf32, #tpu.memory_space<vmem>>, %arg4: memref<128x128xf32, #tpu.memory_space<vmem>>, %arg5: memref<256x128xf32, #tpu.memory_space<vmem>>, %arg6: memref<256x128xf32, #tpu.memory_space<vmem>>) attributes {dimension_semantics = [#tpu.dimension_semantics<parallel>, #tpu.dimension_semantics<parallel>, #tpu.dimension_semantics<arbitrary>], iteration_bounds = array<i64: 2, 1, 1>, scalar_prefetch = 0 : i64, scratch_operands = 1 : i64, tpu.core_type = #tpu.core_type<tc>, window_params = [{transform_indices = @transform_0, window_bounds = array<i64: 256, 128>}, {transform_indices = @transform_1, window_bounds = array<i64: 128, 128>}, {transform_indices = @transform_2, window_bounds = array<i64: 256, 128>}]} {
    %c0_i32 = arith.constant 0 : i32
    %0 = arith.cmpi eq, %arg2, %c0_i32 : i32
    %1 = arith.extui %0 : i1 to i32
    %c0_i32_0 = arith.constant 0 : i32
    %2 = arith.cmpi ne, %1, %c0_i32_0 : i32
    scf.if %2 {
      %cst_10 = arith.constant 0.000000e+00 : f32
      %12 = vector.broadcast %cst_10 : f32 to vector<256x128xf32>
      %c0_11 = arith.constant 0 : index
      %c0_12 = arith.constant 0 : index
      %13 = vector.load %arg6[%c0_11, %c0_12] : memref<256x128xf32, #tpu.memory_space<vmem>>, vector<256x128xf32>
      tpu.vector_store %arg6[%c0_11, %c0_12], %12 {strides = array<i32>} : memref<256x128xf32, #tpu.memory_space<vmem>>, vector<256x128xf32>,
    } else {
    }
    %c0 = arith.constant 0 : index
    %c0_1 = arith.constant 0 : index
    %3 = vector.load %arg6[%c0, %c0_1] : memref<256x128xf32, #tpu.memory_space<vmem>>, vector<256x128xf32>
    %c0_2 = arith.constant 0 : index
    %c0_3 = arith.constant 0 : index
    %4 = vector.load %arg3[%c0_2, %c0_3] : memref<256x128xf32, #tpu.memory_space<vmem>>, vector<256x128xf32>
    %c0_4 = arith.constant 0 : index
    %c0_5 = arith.constant 0 : index
    %5 = vector.load %arg4[%c0_4, %c0_5] : memref<128x128xf32, #tpu.memory_space<vmem>>, vector<128x128xf32>
    %cst = arith.constant dense<0.000000e+00> : vector<256x128xf32>
    %6 = tpu.matmul %4, %5, %cst {dimension_numbers = #tpu.dot_dimension_numbers<[1], [0], [0], [1], [0, 0, 1, 1], [], []>} : vector<256x128xf32>, vector<128x128xf32>, vector<256x128xf32> -> vector<256x128xf32>
    %7 = arith.addf %3, %6 : vector<256x128xf32>
    %c0_6 = arith.constant 0 : index
    %c0_7 = arith.constant 0 : index
    %8 = vector.load %arg6[%c0_6, %c0_7] : memref<256x128xf32, #tpu.memory_space<vmem>>, vector<256x128xf32>
    tpu.vector_store %arg6[%c0_6, %c0_7], %7 {strides = array<i32>} : memref<256x128xf32, #tpu.memory_space<vmem>>, vector<256x128xf32>,
    %c0_i32_8 = arith.constant 0 : i32
    %9 = arith.cmpi eq, %arg2, %c0_i32_8 : i32
    %10 = arith.extui %9 : i1 to i32
    %c0_i32_9 = arith.constant 0 : i32
    %11 = arith.cmpi ne, %10, %c0_i32_9 : i32
    scf.if %11 {
      %c0_10 = arith.constant 0 : index
      %c0_11 = arith.constant 0 : index
      %12 = vector.load %arg6[%c0_10, %c0_11] : memref<256x128xf32, #tpu.memory_space<vmem>>, vector<256x128xf32>
      %c0_12 = arith.constant 0 : index
      %c0_13 = arith.constant 0 : index
      %13 = vector.load %arg5[%c0_12, %c0_13] : memref<256x128xf32, #tpu.memory_space<vmem>>, vector<256x128xf32>
      tpu.vector_store %arg5[%c0_12, %c0_13], %12 {strides = array<i32>} : memref<256x128xf32, #tpu.memory_space<vmem>>, vector<256x128xf32>,
    } else {
    }
    return
  }
  func.func @transform_0(%arg0: i32, %arg1: i32, %arg2: i32) -> (i32, i32) {
    %c0_i32 = arith.constant 0 : i32
    return %arg0, %arg2 : i32, i32
  }
  func.func @transform_1(%arg0: i32, %arg1: i32, %arg2: i32) -> (i32, i32) {
    %c0_i32 = arith.constant 0 : i32
    return %arg2, %arg1 : i32, i32
  }
  func.func @transform_2(%arg0: i32, %arg1: i32, %arg2: i32) -> (i32, i32) {
    %c0_i32 = arith.constant 0 : i32
    return %arg0, %arg1 : i32, i32
  }
}

</mosaic_0001>

<bundles_post_ra>
// kernel: tpu_custom_call.1
= control target key start
LH: loop header
LB: loop body
LE: loop exit
PB: predicated region body
PF: predicated region fallthrough
CT: control target
= control target key end

     0   :  { %7 = vsyncpa [#allocation4], 0  ;;  %s1482_s0 = inlined_call_operand.hbm [shape: f32[512,128], index: 0, kind: input, shape index: {}]   ;;  %s1483_s1 = inlined_call_operand.hbm [shape: f32[128,128], index: 1, kind: input, shape index: {}]   ;;  %s1484_s2 = inlined_call_operand.hbm [shape: f32[512,128], index: 2, kind: output, shape index: {}]  }
   0x1   :  { %9 = vsyncpa [#allocation4 + $0x1], 0 }
   0x2   :  { %10 = vsyncpa [#allocation7], 0 }
   0x3   :  { %11 = vsyncpa [#allocation5], 0 }
   0x4   :  { %13 = vsyncpa [#allocation5 + $0x1], 0  ;;  %s1222_s9 = smov 0   ;;  %s1224_s10 = smov 0  }
   0x5   :  { %s1226_s11 = smov 0   ;;  %s1228_s12 = smov 0  }
   0x6   :  { %s1230_s13 = smov 0   ;;  %s1232_s14 = smov 0  }
   0x7 LB: > { %s804_s15 = sadd.s32 4294967295, %s1198_s14   ;;  %s805_s16 = sadd.s32 4294967294, %s1198_s14   ;;  %s1198_s14 = sphi %s1232_s14, %s19_s14   ;;  %s1194_s13 = sphi %s1230_s13, %s1504_s13   ;;  %s1190_s12 = sphi %s1228_s12, %s1503_s12   ;;  %s1186_s11 = sphi %s1226_s11, %s1502_s11   ;;  %s1182_s10 = sphi %s1224_s10, %s1501_s10   ;;  %s1178_s9 = sphi %s1222_s9, %s1500_s9  }
   0x8   : > { %p60_p0 = scmp.ne.s32.totalorder %s1182_s10, %s1178_s9  ;;  %p1256_p1 = scmp.eq.s32.totalorder %s804_s15, 0 }
   0x9   : > { %p1260_p2 = scmp.eq.s32.totalorder %s804_s15, 1  ;;  %p120_p3 = scmp.eq.s32.totalorder %s805_s16, 1 }
   0xa   : > { %p1266_p4 = por %p1256_p1, %p60_p0  ;;  %p806_p5 = scmp.ge.s32.totalorder %s1198_s14, 1 }
   0xb   : > { %p1271_p6 = por %p120_p3, %p60_p0  ;;  %p127_p7 = scmp.lt.s32.totalorder %s1198_s14, 3 }
   0xc   : > { %s1489_s19 = scalar_select %p1266_p4, 1, 0 }
   0xd   : > { %s1490_s20 = scalar_select %p1271_p6, 1, 0 }
   0xe   : > { %p1276_p8 = pnand %p806_p5, %p127_p7  ;;  %s1200_s22 = smov [#allocation6]  }
   0xf   : > { %s143_s23 = sshll.u32 %s1200_s22, 4  ;;  %s38_s25 = sadd.s32 1, %s1194_s13  ;;  %s144_s23 = int_to_ptr.vmem [resolvable:$true] %s143_s23 }
  0x10   : > { %p991_p9 = pneg %p1276_p8  ;;  %s1071_s26 = scalar_lea.vmem %s144_s23, 2048 }
  0x11   : > { %p1072_p13 = scmp.ne.s32.totalorder %s144_s23, %s1071_s26  ;;  %p1079_p5 = scmp.lt.s32.totalorder %s144_s23, %s144_s23 }
  0x12   : > { %p1285_p11 = pnand %p991_p9, %p1256_p1  ;;  %p1080_p7 = scmp.lt.s32.totalorder %s1071_s26, %s1071_s26 }
  0x14   : > { %p1062_p12 = pneg %p1285_p11  ;;  %p1081_p6 = por %p1080_p7, %p1079_p5 }
  0x16   : > { %p1074_p0 = pnand %p1072_p13, %p1062_p12 }
  0x18   : > { %p1075_p3 = pneg %p1074_p0 }
  0x1a   : > { %p1082_p4 = pnand %p1081_p6, %p1075_p3 }
  0x1c   : > { %1085 = shalt.err (!%p1082_p4)
}
  0x1d   : > { %s1486_s27 = smov 128   ;;  %s1202_s28 = smov 8  }
  0x1e   : > { %994 = dma.hbm_to_vmem [thread:$0]  (!%p1285_p11), %s1483_s1, 2048, %s144_s23, [#allocation7], %s1486_s27, %s1486_s27, %s1202_s28  }
  0x1f   : > { %p40_p4 = scmp.ge.s32.totalorder %s38_s25, 2  ;;  %s47_s3 = sadd.s32 1, %s1186_s11 }
  0x20   : > { %p54_p6 = scmp.ne.s32.totalorder %s1186_s11, %s1182_s10  ;;  %p55_p9 = scmp.eq.s32.totalorder %s1198_s14, 0 }
  0x21   : > { %s1506_s25 = smov (%p40_p4, %s38_s25), 0  ;;  %p1004_p0 = scmp.lt.s32.totalorder %s1198_s14, 2 }
  0x22   : > { %p1306_p12 = por %p55_p9, %p54_p6  ;;  %p1312_p13 = por %p1260_p2, %p54_p6 }
  0x23   : > { %s42_s6 = ssub.s32 %s1194_s13, %s1506_s25  ;;  %s157_s7 = sand.u32 1, %s1186_s11  }
  0x24   : > { %p45_p11 = scmp.eq.s32.totalorder %s42_s6, 0  ;;  %s809_s8 = sshll.u32 %s157_s7, 8 }
  0x25   : > { %s821_s16 = sshll.u32 %s1194_s13, 12  ;;  %s161_s26 = scalar_lea.vmem [#allocation3], %s809_s8 }
  0x26   : > { %s1321_s15 = scalar_select %p45_p11, %s1186_s11, %s47_s3  }
  0x27   : > { %s168_s24 = scalar_lea.hbm %s1482_s0, %s821_s16  ;;  %s169_s29 = sshll.u32 %s161_s26, 4  ;;  %s170_s29 = int_to_ptr.vmem [resolvable:$true] %s169_s29 }
  0x28   : > { %p1329_p2 = pnand %p1004_p0, %p1306_p12  ;;  %s158_s30 = scalar_lea.sflag [#allocation4], %s157_s7 }
  0x29   : > { %s1099_s6 = scalar_lea.vmem %s170_s29, 4096  ;;  %s1203_s3 = smov [#allocation3]  }
  0x2a   : > { %p1088_p3 = pneg %p1329_p2  ;;  %p1100_p5 = scmp.ne.s32.totalorder %s170_s29, %s1099_s6 }
  0x2b   : > { %s1104_s27 = sshll.u32 %s1203_s3, 4  ;;  %s1105_s27 = int_to_ptr.vmem [resolvable:$false] %s1104_s27 }
  0x2c   : > { %p1102_p7 = pnand %p1100_p5, %p1088_p3  ;;  %s1106_s16 = scalar_lea.vmem %s1105_s27, 8192 }
  0x2d   : > { %p1107_p6 = scmp.lt.s32.totalorder %s170_s29, %s1105_s27  ;;  %p1108_p9 = scmp.lt.s32.totalorder %s1106_s16, %s1099_s6 }
  0x2e   : > { %p1103_p4 = pneg %p1102_p7 }
  0x2f   : > { %p1109_p11 = por %p1108_p9, %p1107_p6 }
  0x31   : > { %p1110_p10 = pnand %p1109_p11, %p1103_p4 }
  0x33   : > { %1113 = shalt.err (!%p1110_p10)
}
  0x34   : > { %s1496_s4 = smov 128   ;;  %181 = sbr.rel (%p1276_p8) target bundleno = 331 (0x14b), region = 28 }
  0x35   : > { %998 = dma.hbm_to_vmem [thread:$0]  (!%p1329_p2), %s168_s24, 4096, %s170_s29, %s158_s30, %s1496_s4, %s1496_s4, %s1202_s28  }
  0x36   : > { %s1343_s7 = sand.u32 (!%p1276_p8), 1, %s1182_s10   ;;  %p1497_p10 = scmp.ne.s32.totalorder (!%p1276_p8), %s1489_s19, 0 }
  0x37   : > { %s813_s27 = sshll.u32 (!%p1276_p8), %s1343_s7, 8  ;;  %s184_s8 = scalar_lea.sflag (!%p1276_p8), [#allocation4], %s1343_s7 }
  0x38   : > { %s1349_s22 = scalar_lea.vmem (!%p1276_p8), [#allocation3], %s813_s27 }
  0x39   : > { %1165 = dma.done.wait (%p1497_p10), %s184_s8, 4096  }
  0x3a   : > { %1167 = vsyncadd (%p1497_p10), %s184_s8, 4294963200 }
  0x3b   : > { %1169 = dma.done.wait (%p1256_p1), [#allocation7], 2048  }
  0x3c   : > { %1171 = vsyncadd (%p1256_p1), [#allocation7], 4294965248  ;;  %v330_v0 = vld [vmem:[#allocation6 + $0x78] sm:$0xff]  ;;  %v329_v1 = vld [vmem:[#allocation6 + $0x70] sm:$0xff]  ;;  %s1393_s17 = scalar_lea.vmem [#allocation8], %s813_s27  ;;  %s822_s19 = sshll.u32 %s1190_s12, 12 }
  0x3d   : > { %871 = vmatprep.subr.mxu0 %v330_v0  ;;  %951 = vmatprep.subr.mxu1 %v330_v0  ;;  %v328_v2 = vld [vmem:[#allocation6 + $0x68] sm:$0xff]  ;;  %v327_v3 = vld [vmem:[#allocation6 + $0x60] sm:$0xff]  ;;  %v326_v4 = vld [vmem:[#allocation6 + $0x58] sm:$0xff]  ;;  %s702_s21 = sshll.u32 %s1393_s17, 4  ;;  %s1428_s24 = scalar_lea.hbm %s1484_s2, %s822_s19  ;;  %s1430_s21 = int_to_ptr.vmem [resolvable:$true] %s702_s21 }
  0x3e   : > { %872 = vmatpush3.msra.mxu0 %v330_v0  ;;  %967 = vmatpush3.msra.mxu1 %v330_v0  ;;  %v325_v5 = vld [vmem:[#allocation6 + $0x50] sm:$0xff]  ;;  %v324_v6 = vld [vmem:[#allocation6 + $0x48] sm:$0xff]  ;;  %v323_v7 = vld [vmem:[#allocation6 + $0x40] sm:$0xff]  ;;  %s688_s12 = scalar_lea.sflag [#allocation5], %s1343_s7  ;;  %s1114_s26 = scalar_lea.vmem %s1430_s21, 4096 }
  0x3f   : > { %873 = vmatprep.subr.mxu0 %v329_v1  ;;  %952 = vmatprep.subr.mxu1 %v329_v1  ;;  %v322_v8 = vld [vmem:[#allocation6 + $0x38] sm:$0xff]  ;;  %v321_v9 = vld [vmem:[#allocation6 + $0x30] sm:$0xff]  ;;  %v320_v10 = vld [vmem:[#allocation6 + $0x28] sm:$0xff]  ;;  %p1115_p1 = scmp.ne.s32.totalorder %s1430_s21, %s1114_s26  ;;  %s1204_s29 = smov [#allocation8]  }
  0x40   : > { %874 = vmatpush3.msra.mxu0 %v329_v1  ;;  %968 = vmatpush3.msra.mxu1 %v329_v1  ;;  %v319_v11 = vld [vmem:[#allocation6 + $0x20] sm:$0xff]  ;;  %v318_v12 = vld [vmem:[#allocation6 + $0x18] sm:$0xff]  ;;  %v317_v13 = vld [vmem:[#allocation6 + $0x10] sm:$0xff]  ;;  %s1118_s18 = sshll.u32 %s1204_s29, 4  ;;  %s1119_s18 = int_to_ptr.vmem [resolvable:$false] %s1118_s18 }
  0x41   : > { %875 = vmatprep.subr.mxu0 %v328_v2  ;;  %953 = vmatprep.subr.mxu1 %v328_v2  ;;  %v316_v14 = vld [vmem:[#allocation6 + $0x8] sm:$0xff]  ;;  %v315_v15 = vld [vmem:[#allocation6] sm:$0xff]  ;;  %v285_v20 = vld [vmem:[%s1349_s22 + $0x10] sm:$0xff]  ;;  %p1116_p8 = pnand %p1115_p1, %p1312_p13  ;;  %s1120_s30 = scalar_lea.vmem %s1119_s18, 8192 }
  0x42   : > { %876 = vmatpush3.msra.mxu0 %v328_v2  ;;  %969 = vmatpush3.msra.mxu1 %v328_v2  ;;  %v283_v16 = vld [vmem:[%s1349_s22] sm:$0xff]  ;;  %v284_v18 = vld [vmem:[%s1349_s22 + $0x8] sm:$0xff]  ;;  %v301_v21 = vld [vmem:[%s1349_s22 + $0x90] sm:$0xff]  ;;  %p1121_p0 = scmp.lt.s32.totalorder %s1430_s21, %s1119_s18  ;;  %p1122_p2 = scmp.lt.s32.totalorder %s1120_s30, %s1114_s26 }
  0x43   : > { %877 = vmatprep.subr.mxu0 %v327_v3  ;;  %954 = vmatprep.subr.mxu1 %v327_v3  ;;  %v299_v17 = vld [vmem:[%s1349_s22 + $0x80] sm:$0xff]  ;;  %v300_v19 = vld [vmem:[%s1349_s22 + $0x88] sm:$0xff]  ;;  %v286_v22 = vld [vmem:[%s1349_s22 + $0x18] sm:$0xff]  ;;  %p1117_p12 = pneg %p1116_p8 }
  0x44   : > { %878 = vmatpush3.msra.mxu0 %v327_v3  ;;  %970 = vmatpush3.msra.mxu1 %v327_v3  ;;  %v302_v23 = vld [vmem:[%s1349_s22 + $0x98] sm:$0xff]  ;;  %v287_v24 = vld [vmem:[%s1349_s22 + $0x20] sm:$0xff]  ;;  %v288_v26 = vld [vmem:[%s1349_s22 + $0x28] sm:$0xff]  ;;  %p1123_p3 = por %p1122_p2, %p1121_p0 }
  0x45   : > { %879 = vmatprep.subr.mxu0 %v326_v4  ;;  %955 = vmatprep.subr.mxu1 %v326_v4  ;;  %v303_v25 = vld [vmem:[%s1349_s22 + $0xa0] sm:$0xff]  ;;  %v304_v27 = vld [vmem:[%s1349_s22 + $0xa8] sm:$0xff]  ;;  %v289_v28 = vld [vmem:[%s1349_s22 + $0x30] sm:$0xff] }
  0x46   : > { %880 = vmatpush3.msra.mxu0 %v326_v4  ;;  %971 = vmatpush3.msra.mxu1 %v326_v4  ;;  %v305_v29 = vld [vmem:[%s1349_s22 + $0xb0] sm:$0xff]  ;;  %v290_v30 = vld [vmem:[%s1349_s22 + $0x38] sm:$0xff]  ;;  %v291_v32 = vld [vmem:[%s1349_s22 + $0x40] sm:$0xff]  ;;  %p1124_p5 = pnand %p1123_p3, %p1117_p12 }
  0x47   : > { %881 = vmatprep.subr.mxu0 %v325_v5  ;;  %956 = vmatprep.subr.mxu1 %v325_v5  ;;  %v306_v31 = vld [vmem:[%s1349_s22 + $0xb8] sm:$0xff]  ;;  %v307_v33 = vld [vmem:[%s1349_s22 + $0xc0] sm:$0xff]  ;;  %v292_v34 = vld [vmem:[%s1349_s22 + $0x48] sm:$0xff] }
  0x48   : > { %882 = vmatpush3.msra.mxu0 %v325_v5  ;;  %972 = vmatpush3.msra.mxu1 %v325_v5  ;;  %v308_v35 = vld [vmem:[%s1349_s22 + $0xc8] sm:$0xff]  ;;  %v293_v36 = vld [vmem:[%s1349_s22 + $0x50] sm:$0xff]  ;;  %v294_v38 = vld [vmem:[%s1349_s22 + $0x58] sm:$0xff] }
  0x49   : > { %883 = vmatprep.subr.mxu0 %v324_v6  ;;  %957 = vmatprep.subr.mxu1 %v324_v6  ;;  %v309_v37 = vld [vmem:[%s1349_s22 + $0xd0] sm:$0xff]  ;;  %v310_v39 = vld [vmem:[%s1349_s22 + $0xd8] sm:$0xff]  ;;  %v295_v40 = vld [vmem:[%s1349_s22 + $0x60] sm:$0xff] }
  0x4a   : > { %884 = vmatpush3.msra.mxu0 %v324_v6  ;;  %973 = vmatpush3.msra.mxu1 %v324_v6  ;;  %v311_v41 = vld [vmem:[%s1349_s22 + $0xe0] sm:$0xff]  ;;  %v296_v42 = vld [vmem:[%s1349_s22 + $0x68] sm:$0xff]  ;;  %v297_v44 = vld [vmem:[%s1349_s22 + $0x70] sm:$0xff] }
  0x4b   : > { %885 = vmatprep.subr.mxu0 %v323_v7  ;;  %958 = vmatprep.subr.mxu1 %v323_v7  ;;  %v312_v43 = vld [vmem:[%s1349_s22 + $0xe8] sm:$0xff]  ;;  %v313_v45 = vld [vmem:[%s1349_s22 + $0xf0] sm:$0xff]  ;;  %v298_v46 = vld [vmem:[%s1349_s22 + $0x78] sm:$0xff] }
  0x4c   : > { %886 = vmatpush3.msra.mxu0 %v323_v7  ;;  %974 = vmatpush3.msra.mxu1 %v323_v7  ;;  %v314_v47 = vld [vmem:[%s1349_s22 + $0xf8] sm:$0xff] }
  0x4d   : > { %887 = vmatprep.subr.mxu0 %v322_v8  ;;  %959 = vmatprep.subr.mxu1 %v322_v8 }
  0x4e   : > { %888 = vmatpush3.msra.mxu0 %v322_v8  ;;  %975 = vmatpush3.msra.mxu1 %v322_v8 }
  0x4f   : > { %889 = vmatprep.subr.mxu0 %v321_v9  ;;  %960 = vmatprep.subr.mxu1 %v321_v9 }
  0x50   : > { %890 = vmatpush3.msra.mxu0 %v321_v9  ;;  %976 = vmatpush3.msra.mxu1 %v321_v9 }
  0x51   : > { %891 = vmatprep.subr.mxu0 %v320_v10  ;;  %961 = vmatprep.subr.mxu1 %v320_v10 }
  0x52   : > { %892 = vmatpush3.msra.mxu0 %v320_v10  ;;  %977 = vmatpush3.msra.mxu1 %v320_v10 }
  0x53   : > { %893 = vmatprep.subr.mxu0 %v319_v11  ;;  %962 = vmatprep.subr.mxu1 %v319_v11 }
  0x54   : > { %894 = vmatpush3.msra.mxu0 %v319_v11  ;;  %978 = vmatpush3.msra.mxu1 %v319_v11 }
  0x55   : > { %895 = vmatprep.subr.mxu0 %v318_v12  ;;  %963 = vmatprep.subr.mxu1 %v318_v12 }
  0x56   : > { %896 = vmatpush3.msra.mxu0 %v318_v12  ;;  %979 = vmatpush3.msra.mxu1 %v318_v12 }
  0x57   : > { %897 = vmatprep.subr.mxu0 %v317_v13  ;;  %964 = vmatprep.subr.mxu1 %v317_v13 }
  0x58   : > { %898 = vmatpush3.msra.mxu0 %v317_v13  ;;  %980 = vmatpush3.msra.mxu1 %v317_v13 }
  0x59   : > { %899 = vmatprep.subr.mxu0 %v316_v14  ;;  %965 = vmatprep.subr.mxu1 %v316_v14 }
  0x5a   : > { %900 = vmatpush3.msra.mxu0 %v316_v14  ;;  %981 = vmatpush3.msra.mxu1 %v316_v14 }
  0x5b   : > { %901 = vmatprep.subr.mxu0 %v315_v15  ;;  %966 = vmatprep.subr.mxu1 %v315_v15 }
  0x5c   : > { %902 = vmatpush3.msra.mxu0 %v315_v15  ;;  %982 = vmatpush3.msra.mxu1 %v315_v15 }
  0x5d   : > { %903 = vmatprep.mubr.f32.mxu0 %v283_v16  ;;  %927 = vmatprep.mubr.f32.mxu1 %v299_v17 }
  0x5e   : > { %904 = vmatmul.mubr.f32.vlgmr.msra.gmra.mxu0 %v284_v18  ;;  %928 = vmatmul.mubr.f32.vlgmr.msra.gmra.mxu1 %v300_v19 }
  0x5f   : > { %906 = vmatprep.mubr.f32.mxu0 %v285_v20  ;;  %930 = vmatprep.mubr.f32.mxu1 %v301_v21 }
  0x62   : > { %907 = vmatmul.mubr.f32.gmra.mxu0 %v286_v22  ;;  %931 = vmatmul.mubr.f32.gmra.mxu1 %v302_v23 }
  0x63   : > { %909 = vmatprep.mubr.f32.mxu0 %v287_v24  ;;  %933 = vmatprep.mubr.f32.mxu1 %v303_v25 }
  0x66   : > { %910 = vmatmul.mubr.f32.gmra.mxu0 %v288_v26  ;;  %934 = vmatmul.mubr.f32.gmra.mxu1 %v304_v27 }
  0x67   : > { %912 = vmatprep.mubr.f32.mxu0 %v289_v28  ;;  %936 = vmatprep.mubr.f32.mxu1 %v305_v29 }
  0x6a   : > { %913 = vmatmul.mubr.f32.gmra.mxu0 %v290_v30  ;;  %937 = vmatmul.mubr.f32.gmra.mxu1 %v306_v31 }
  0x6b   : > { %915 = vmatprep.mubr.f32.mxu0 %v291_v32  ;;  %939 = vmatprep.mubr.f32.mxu1 %v307_v33 }
  0x6e   : > { %916 = vmatmul.mubr.f32.gmra.mxu0 %v292_v34  ;;  %940 = vmatmul.mubr.f32.gmra.mxu1 %v308_v35 }
  0x6f   : > { %918 = vmatprep.mubr.f32.mxu0 %v293_v36  ;;  %942 = vmatprep.mubr.f32.mxu1 %v309_v37 }
  0x72   : > { %919 = vmatmul.mubr.f32.gmra.mxu0 %v294_v38  ;;  %943 = vmatmul.mubr.f32.gmra.mxu1 %v310_v39 }
  0x73   : > { %921 = vmatprep.mubr.f32.mxu0 %v295_v40  ;;  %945 = vmatprep.mubr.f32.mxu1 %v311_v41 }
  0x76   : > { %922 = vmatmul.mubr.f32.gmra.mxu0 %v296_v42  ;;  %946 = vmatmul.mubr.f32.gmra.mxu1 %v312_v43 }
  0x77   : > { %924 = vmatprep.mubr.f32.mxu0 %v297_v44  ;;  %948 = vmatprep.mubr.f32.mxu1 %v313_v45 }
  0x7a   : > { %925 = vmatmul.mubr.f32.gmra.mxu0 %v298_v46  ;;  %949 = vmatmul.mubr.f32.gmra.mxu1 %v314_v47 }
 0x11e   : > { %v905_v48 = vpop.f32.mrf.mxu0  ;;  %v929_v49 = vpop.f32.mrf.mxu1 }
 0x11f   : > { %656 = vst [vmem:[%s1393_s17 + $0x8] sm:$0xff] %v905_v48  ;;  %672 = vst [vmem:[%s1393_s17 + $0x88] sm:$0xff] %v929_v49 }
 0x120   : > { %v397_v50 = vpop.f32.mrf.mxu0  ;;  %v477_v51 = vpop.f32.mrf.mxu1 }
 0x121   : > { %655 = vst [vmem:[%s1393_s17] sm:$0xff] %v397_v50  ;;  %671 = vst [vmem:[%s1393_s17 + $0x80] sm:$0xff] %v477_v51 }
 0x122   : > { %v908_v52 = vpop.f32.mrf.mxu0  ;;  %v932_v53 = vpop.f32.mrf.mxu1 }
 0x123   : > { %658 = vst [vmem:[%s1393_s17 + $0x18] sm:$0xff] %v908_v52  ;;  %674 = vst [vmem:[%s1393_s17 + $0x98] sm:$0xff] %v932_v53 }
 0x124   : > { %v407_v54 = vpop.f32.mrf.mxu0  ;;  %v487_v55 = vpop.f32.mrf.mxu1 }
 0x125   : > { %657 = vst [vmem:[%s1393_s17 + $0x10] sm:$0xff] %v407_v54  ;;  %673 = vst [vmem:[%s1393_s17 + $0x90] sm:$0xff] %v487_v55 }
 0x126   : > { %v911_v56 = vpop.f32.mrf.mxu0  ;;  %v935_v57 = vpop.f32.mrf.mxu1 }
 0x127   : > { %660 = vst [vmem:[%s1393_s17 + $0x28] sm:$0xff] %v911_v56  ;;  %676 = vst [vmem:[%s1393_s17 + $0xa8] sm:$0xff] %v935_v57 }
 0x128   : > { %v417_v58 = vpop.f32.mrf.mxu0  ;;  %v497_v59 = vpop.f32.mrf.mxu1 }
 0x129   : > { %659 = vst [vmem:[%s1393_s17 + $0x20] sm:$0xff] %v417_v58  ;;  %675 = vst [vmem:[%s1393_s17 + $0xa0] sm:$0xff] %v497_v59 }
 0x12a   : > { %v914_v60 = vpop.f32.mrf.mxu0  ;;  %v938_v61 = vpop.f32.mrf.mxu1 }
 0x12b   : > { %662 = vst [vmem:[%s1393_s17 + $0x38] sm:$0xff] %v914_v60  ;;  %678 = vst [vmem:[%s1393_s17 + $0xb8] sm:$0xff] %v938_v61 }
 0x12c   : > { %v427_v62 = vpop.f32.mrf.mxu0  ;;  %v507_v63 = vpop.f32.mrf.mxu1 }
 0x12d   : > { %661 = vst [vmem:[%s1393_s17 + $0x30] sm:$0xff] %v427_v62  ;;  %677 = vst [vmem:[%s1393_s17 + $0xb0] sm:$0xff] %v507_v63 }
 0x12e   : > { %v917_v0 = vpop.f32.mrf.mxu0  ;;  %v941_v1 = vpop.f32.mrf.mxu1 }
 0x12f   : > { %664 = vst [vmem:[%s1393_s17 + $0x48] sm:$0xff] %v917_v0  ;;  %680 = vst [vmem:[%s1393_s17 + $0xc8] sm:$0xff] %v941_v1 }
 0x130   : > { %v437_v2 = vpop.f32.mrf.mxu0  ;;  %v517_v3 = vpop.f32.mrf.mxu1 }
 0x131   : > { %663 = vst [vmem:[%s1393_s17 + $0x40] sm:$0xff] %v437_v2  ;;  %679 = vst [vmem:[%s1393_s17 + $0xc0] sm:$0xff] %v517_v3 }
 0x132   : > { %v920_v4 = vpop.f32.mrf.mxu0  ;;  %v944_v5 = vpop.f32.mrf.mxu1 }
 0x133   : > { %666 = vst [vmem:[%s1393_s17 + $0x58] sm:$0xff] %v920_v4  ;;  %682 = vst [vmem:[%s1393_s17 + $0xd8] sm:$0xff] %v944_v5 }
 0x134   : > { %v447_v6 = vpop.f32.mrf.mxu0  ;;  %v527_v7 = vpop.f32.mrf.mxu1 }
 0x135   : > { %665 = vst [vmem:[%s1393_s17 + $0x50] sm:$0xff] %v447_v6  ;;  %681 = vst [vmem:[%s1393_s17 + $0xd0] sm:$0xff] %v527_v7 }
 0x136   : > { %v923_v8 = vpop.f32.mrf.mxu0  ;;  %v947_v9 = vpop.f32.mrf.mxu1 }
 0x137   : > { %668 = vst [vmem:[%s1393_s17 + $0x68] sm:$0xff] %v923_v8  ;;  %684 = vst [vmem:[%s1393_s17 + $0xe8] sm:$0xff] %v947_v9 }
 0x138   : > { %v457_v10 = vpop.f32.mrf.mxu0  ;;  %v537_v11 = vpop.f32.mrf.mxu1 }
 0x139   : > { %667 = vst [vmem:[%s1393_s17 + $0x60] sm:$0xff] %v457_v10  ;;  %683 = vst [vmem:[%s1393_s17 + $0xe0] sm:$0xff] %v537_v11 }
 0x13a   : > { %v926_v12 = vpop.f32.mrf.mxu0  ;;  %v950_v13 = vpop.f32.mrf.mxu1 }
 0x13b   : > { %670 = vst [vmem:[%s1393_s17 + $0x78] sm:$0xff] %v926_v12  ;;  %686 = vst [vmem:[%s1393_s17 + $0xf8] sm:$0xff] %v950_v13 }
 0x13c   : > { %v467_v14 = vpop.f32.mrf.mxu0  ;;  %v547_v15 = vpop.f32.mrf.mxu1 }
 0x13d   : > { %669 = vst [vmem:[%s1393_s17 + $0x70] sm:$0xff] %v467_v14  ;;  %685 = vst [vmem:[%s1393_s17 + $0xf0] sm:$0xff] %v547_v15 }
 0x13e   : > { %1127 = shalt.err (!%p1124_p5)
}
 0x13f   : > { %s1128_s6 = scalar_lea.hbm %s1428_s24, 4096  ;;  %s1132_s4 = scalar_lea.hbm %s1484_s2, 8192 }
 0x140   : > { %p1129_p7 = scmp.ne.s32.totalorder %s1428_s24, %s1128_s6  ;;  %p1133_p9 = scmp.lt.s32.totalorder %s1428_s24, %s1484_s2 }
 0x141   : > { %p1134_p11 = scmp.lt.s32.totalorder %s1132_s4, %s1128_s6 }
 0x142   : > { %p1130_p4 = pnand %p1129_p7, %p1312_p13 }
 0x143   : > { %p1135_p10 = por %p1134_p11, %p1133_p9 }
 0x144   : > { %p1131_p6 = pneg %p1130_p4 }
 0x146   : > { %p1136_p1 = pnand %p1135_p10, %p1131_p6 }
 0x148   : > { %1139 = shalt.err (!%p1136_p1)
}
 0x149   : > { %s1205_s22 = smov 128   ;;  %s1206_s17 = smov 8  }
 0x14a   : > { %989 = dma.vmem_to_hbm [thread:$0]  (%p1312_p13), %s1430_s21, 4096, %s1428_s24, %s688_s12, %s1205_s22, %s1205_s22, %s1206_s17  }
 0x14b PF: > { %s717_s19 = sand.u32 1, %s1178_s9   ;;  %p1498_p8 = scmp.ne.s32.totalorder %s1490_s20, 0 }
 0x14c   : > { %p1499_p12 = scmp.ge.s32.totalorder %s1198_s14, 2  ;;  %s718_s28 = scalar_lea.sflag [#allocation5], %s717_s19 }
 0x14e   : > { %p1000_p0 = pnand %p1499_p12, %p1498_p8 }
 0x150   : > { %p1001_p2 = pneg %p1000_p0 }
 0x152   : > { %1173 = dma.done.wait (%p1001_p2), %s718_s28, 4096  }
 0x153   : > { %1175 = vsyncadd (%p1001_p2), %s718_s28, 4294963200  ;;  %s19_s14 = sadd.s32 1, %s1198_s14   ;;  %s1500_s9 = smov %s1182_s10 }
 0x154   : > { %p16_p3 = scmp.ge.s32.totalorder %s19_s14, 4   ;;  %s1501_s10 = smov %s1186_s11 }
 0x155   : > { %s1502_s11 = smov %s1321_s15  ;;  %s1503_s12 = smov %s1194_s13 }
 0x156   : > { %s1504_s13 = smov %s1506_s25  ;;  %18 = sbr.rel (!%p16_p3) target bundleno = 7 (0x7), region = 86 }
 0x15b   :  { %723 = vsyncpa [#allocation4], 1 }
 0x15c   :  { %725 = vsyncpa [#allocation4 + $0x1], 1 }
 0x15d   :  { %726 = vsyncpa [#allocation7], 1 }
 0x15e   :  { %727 = vsyncpa [#allocation5], 1 }
 0x15f   :  { %729 = vsyncpa [#allocation5 + $0x1], 1 }

</bundles_post_ra>
